<compile_context>
chip_gen: v7x
topology: tpu7x:2x2x1
jax: 0.10.0
libtpu: 0.0.40
codegen_flags: <defaults>
</compile_context>

<pallas_src>
import functools

import jax
import jax.numpy as jnp
from jax.experimental import pallas as pl
from jax.experimental.pallas import tpu as pltpu


# ---------------------------------------------------------------------------
# Tiling / VMEM helpers
# ---------------------------------------------------------------------------

def _round_up(a, b):
    return ((a + b - 1) // b) * b


def _sublane_multiple(dtype):
    # 8 sublanes per f32 vreg; sub-32-bit dtypes pack along sublanes.
    itemsize = jnp.dtype(dtype).itemsize
    return 8 * max(1, 4 // itemsize)  # 8 (f32), 16 (bf16/f16), 32 (i8/fp8)


def _vmem_limit_bytes():
    # Raise the scoped VMEM limit per generation, leaving headroom:
    # v7x: 64 MiB physical -> 48 MiB scoped; v5e/v6e: 128 MiB -> 64 MiB scoped.
    try:
        cap = pltpu.get_tpu_info().vmem_capacity_bytes
    except Exception:
        cap = 64 * 1024 * 1024
    return int(min(cap * 3 // 4, 64 * 1024 * 1024))


def _choose_row_tile(n_rows, dim, dtype,
                     io_budget_bytes=16 * 1024 * 1024, max_tile=1024):
    """Largest dtype-aligned row tile whose double-buffered I/O fits budget."""
    sub = _sublane_multiple(dtype)
    itemsize = jnp.dtype(dtype).itemsize
    # 2 double-buffered input blocks + 2 double-buffered output blocks.
    bytes_per_row = 4 * dim * itemsize
    tile = io_budget_bytes // max(bytes_per_row, 1)
    tile = min(tile, max_tile, _round_up(n_rows, sub))
    if n_rows > sub:
        # Keep >= 2 grid steps so the row axis can shard over v7x's 2 TCs.
        tile = min(tile, _round_up(pl.cdiv(n_rows, 2), sub))
    return max(sub, (tile // sub) * sub)


# ---------------------------------------------------------------------------
# Kernel 1: standalone gain-only LayerNorm
# ---------------------------------------------------------------------------

def _layernorm_kernel(x_ref, g_ref, o_ref, *, eps):
    # x_ref: (ROW_TILE, D), g_ref: (1, D), o_ref: (ROW_TILE, D)
    x = x_ref[...].astype(jnp.float32)
    mean = jnp.mean(x, axis=-1, keepdims=True)
    centered = x - mean
    var = jnp.mean(centered * centered, axis=-1, keepdims=True)  # unbiased=False
    y = centered * jax.lax.rsqrt(var + eps) * g_ref[...].astype(jnp.float32)
    o_ref[...] = y.astype(o_ref.dtype)


def layernorm(x, g):
    """Gain-only LayerNorm over the last axis (Pallas kernel).

    Assumes the normalized axis maps to TPU lanes: for full lane utilization
    dim should be >= 128 and ideally a multiple of 128.
    """
    orig_shape = x.shape
    dim = orig_shape[-1]
    assert g.shape == (dim,)
    eps = 1e-5 if x.dtype == jnp.float32 else 1e-3  # matches the torch module

    x2 = x.reshape(-1, dim)
    n_rows = x2.shape[0]
    row_tile = _choose_row_tile(n_rows, dim, x.dtype)
    grid = (pl.cdiv(n_rows, row_tile),)  # no host padding: tail block is masked

    out = pl.pallas_call(
        functools.partial(_layernorm_kernel, eps=eps),
        out_shape=jax.ShapeDtypeStruct((n_rows, dim), x.dtype),
        grid_spec=pltpu.PrefetchScalarGridSpec(
            num_scalar_prefetch=0,
            grid=grid,
            in_specs=[
                pl.BlockSpec((row_tile, dim), lambda i: (i, 0)),
                pl.BlockSpec((1, dim), lambda i: (0, 0)),
            ],
            out_specs=pl.BlockSpec((row_tile, dim), lambda i: (i, 0)),
        ),
        compiler_params=pltpu.CompilerParams(
            dimension_semantics=("parallel",),
            vmem_limit_bytes=_vmem_limit_bytes(),
        ),
    )(x2, g.reshape(1, dim))
    return out.reshape(orig_shape)


# ---------------------------------------------------------------------------
# Kernel 2: LayerNorm fused into the consumer projection:  LN(x) @ W
# ---------------------------------------------------------------------------

def _ln_matmul_kernel(x_ref, g_ref, w_ref, o_ref, *, eps):
    # x_ref: (TM, D), g_ref: (1, D), w_ref: (D, TN), o_ref: (TM, TN)
    x = x_ref[...].astype(jnp.float32)
    mean = jnp.mean(x, axis=-1, keepdims=True)
    centered = x - mean
    var = jnp.mean(centered * centered, axis=-1, keepdims=True)
    y = centered * jax.lax.rsqrt(var + eps) * g_ref[...].astype(jnp.float32)
    o_ref[...] = jnp.dot(
        y, w_ref[...].astype(jnp.float32),
        preferred_element_type=jnp.float32,
    ).astype(o_ref.dtype)


def ln_matmul(x, g, w):
    """Fused gain-only LayerNorm (last axis) + bias-free projection."""
    *lead, dim = x.shape
    k_dim, n_dim = w.shape
    assert k_dim == dim and g.shape == (dim,)
    eps = 1e-5 if x.dtype == jnp.float32 else 1e-3

    x2 = x.reshape(-1, dim)
    m = x2.shape[0]

    sub = _sublane_multiple(x.dtype)
    tm = min(256, _round_up(m, sub))
    if m > sub:
        tm = min(tm, _round_up(pl.cdiv(m, 2), sub))  # >= 2 row-steps (v7x)
    tm = max(sub, (tm // sub) * sub)
    tn = n_dim if n_dim <= 512 else 512  # 512 is a multiple of 128 (lane-dense)

    grid = (pl.cdiv(m, tm), pl.cdiv(n_dim, tn))

    out = pl.pallas_call(
        functools.partial(_ln_matmul_kernel, eps=eps),
        out_shape=jax.ShapeDtypeStruct((m, n_dim), x.dtype),
        grid_spec=pltpu.PrefetchScalarGridSpec(
            num_scalar_prefetch=0,
            grid=grid,
            in_specs=[
                pl.BlockSpec((tm, dim), lambda i, j: (i, 0)),
                pl.BlockSpec((1, dim), lambda i, j: (0, 0)),
                pl.BlockSpec((dim, tn), lambda i, j: (0, j)),
            ],
            out_specs=pl.BlockSpec((tm, tn), lambda i, j: (i, j)),
        ),
        compiler_params=pltpu.CompilerParams(
            dimension_semantics=("parallel", "parallel"),
            vmem_limit_bytes=_vmem_limit_bytes(),
        ),
    )(x2, g.reshape(1, dim), w)
    return out.reshape(*lead, n_dim)


# ---------------------------------------------------------------------------
# TextTransformer forward (semantics of the PyTorch reference module)
# ---------------------------------------------------------------------------

def _attention_block(x, p, mask, *, heads, scale, ln, ln_mm):
    b, n, _ = x.shape
    # PreNorm + to_qkv fused: LN(x) @ W_qkv
    qkv = ln_mm(x, p["prenorm_g"], p["w_qkv"])
    q, k, v = jnp.split(qkv, 3, axis=-1)

    def to_heads(t):
        return t.reshape(b, n, heads, -1).transpose(0, 2, 1, 3)

    q, k, v = map(to_heads, (q, k, v))
    q = q * scale
    sim = jnp.einsum("bhid,bhjd->bhij", q, k)
    if mask is not None:
        mask_value = -jnp.finfo(sim.dtype).max
        sim = jnp.where(mask[:, None, None, :], sim, mask_value)
    # TODO(synk): non-causal path only (module default causal=False); a fused
    # flash-attention Pallas kernel for QK^T/softmax/AV is the next fusion step.
    attn = jax.nn.softmax(sim.astype(jnp.float32), axis=-1).astype(sim.dtype)
    out = jnp.einsum("bhij,bhjd->bhid", attn, v)
    out = out.transpose(0, 2, 1, 3).reshape(b, n, -1)
    out = out @ p["w_out"]          # to_out linear (bias-free)
    return ln(out, p["out_ln_g"])   # to_out LayerNorm


def _feedforward_block(x, p, *, ln_mm):
    # PreNorm + first projection fused: LN(x) @ W_ff1
    h = ln_mm(x, p["prenorm_g"], p["w_ff1"])
    val, gate = jnp.split(h, 2, axis=-1)
    h = val * jax.nn.gelu(gate, approximate=False)   # GEGLU (exact gelu)
    # Inner LayerNorm fused into the output projection: LN(h) @ W_ff2
    return ln_mm(h, p["ff_ln_g"], p["w_ff2"])


def text_transformer_forward(params, tokens, mask=None, *, heads, dim_head,
                             ln, ln_mm):
    b, n = tokens.shape
    dim = params["token_emb"].shape[-1]
    scale = dim_head ** -0.5

    x = params["token_emb"][tokens]                 # token embedding
    x = x + params["abs_pos_emb"][:n][None, :, :]   # absolute position embedding
    cls = jnp.broadcast_to(params["cls_token"], (b, 1, dim))
    x = jnp.concatenate([cls, x], axis=1)           # prepend CLS token
    if mask is not None:
        mask = jnp.pad(mask, ((0, 0), (1, 0)), constant_values=True)

    x = ln(x, params["norm_in_g"])
    for layer in params["layers"]:
        x = _attention_block(x, layer["attn"], mask,
                             heads=heads, scale=scale, ln=ln, ln_mm=ln_mm) + x
        x = _feedforward_block(x, layer["ff"], ln_mm=ln_mm) + x
    return ln(x, params["norm_out_g"])


# ---------------------------------------------------------------------------
# Pure-JAX reference (same structure, no Pallas) for correctness checking
# ---------------------------------------------------------------------------

def layernorm_ref(x, g):
    eps = 1e-5 if x.dtype == jnp.float32 else 1e-3
    mean = jnp.mean(x, axis=-1, keepdims=True)
    var = jnp.mean((x - mean) ** 2, axis=-1, keepdims=True)
    return (x - mean) * jax.lax.rsqrt(var + eps) * g


def ln_matmul_ref(x, g, w):
    return layernorm_ref(x, g) @ w


# ---------------------------------------------------------------------------
# Parameter init (same parameterization as the torch module, bias-free Linears)
# ---------------------------------------------------------------------------

def init_params(key, *, num_tokens, max_seq_len, dim, dim_head, heads, depth,
                ff_mult):
    inner = dim_head * heads
    ff_inner = dim * ff_mult
    keys = iter(jax.random.split(key, 3 + 4 * depth))

    def rand(shape, scale):
        return scale * jax.random.normal(next(keys), shape, dtype=jnp.float32)

    params = {
        "token_emb": rand((num_tokens, dim), 0.02),
        "abs_pos_emb": rand((max_seq_len, dim), 0.02),
        "cls_token": rand((dim,), 1.0),
        "norm_in_g": jnp.ones((dim,), jnp.float32),
        "norm_out_g": jnp.ones((dim,), jnp.float32),
        "layers": [],
    }
    for _ in range(depth):
        params["layers"].append({
            "attn": {
                "prenorm_g": jnp.ones((dim,), jnp.float32),
                "w_qkv": rand((dim, 3 * inner), dim ** -0.5),
                "w_out": rand((inner, dim), inner ** -0.5),
                "out_ln_g": jnp.ones((dim,), jnp.float32),
            },
            "ff": {
                "prenorm_g": jnp.ones((dim,), jnp.float32),
                "w_ff1": rand((dim, 2 * ff_inner), dim ** -0.5),
                "ff_ln_g": jnp.ones((ff_inner,), jnp.float32),
                "w_ff2": rand((ff_inner, dim), ff_inner ** -0.5),
            },
        })
    return params


# ---------------------------------------------------------------------------
# Demo / self-check
# ---------------------------------------------------------------------------

if __name__ == "__main__":
    # Small shapes consistent with the module, but lane-dense (dim % 128 == 0).
    batch, seq_len = 2, 8
    dim, dim_head, heads, depth, ff_mult = 128, 32, 4, 2, 4
    num_tokens, max_seq_len = 256, 64

    root = jax.random.PRNGKey(0)
    k_params, k_tokens, k_ln_x, k_ln_g = jax.random.split(root, 4)

    params = init_params(k_params, num_tokens=num_tokens,
                         max_seq_len=max_seq_len, dim=dim, dim_head=dim_head,
                         heads=heads, depth=depth, ff_mult=ff_mult)
    tokens = jax.random.randint(k_tokens, (batch, seq_len), 0, num_tokens,
                                dtype=jnp.int32)

    # 1) Tight unit check of the standalone LayerNorm kernel (multi-step grid).
    x_ln = jax.random.normal(k_ln_x, (4, 64, dim), dtype=jnp.float32)
    g_ln = 1.0 + 0.1 * jax.random.normal(k_ln_g, (dim,), dtype=jnp.float32)
    y_ln = jax.block_until_ready(layernorm(x_ln, g_ln))
    assert jnp.allclose(y_ln, layernorm_ref(x_ln, g_ln), atol=1e-5, rtol=1e-5)

    # 2) Full TextTransformer forward using the Pallas kernels.
    out = text_transformer_forward(params, tokens, mask=None,
                                   heads=heads, dim_head=dim_head,
                                   ln=layernorm, ln_mm=ln_matmul)
    out = jax.block_until_ready(out)
    assert out.shape == (batch, seq_len + 1, dim)   # +1 for the CLS token
    assert bool(jnp.all(jnp.isfinite(out)))

    # Pure-JAX reference with identical weights and structure.
    out_ref = text_transformer_forward(params, tokens, mask=None,
                                       heads=heads, dim_head=dim_head,
                                       ln=layernorm_ref, ln_mm=ln_matmul_ref)
    assert jnp.allclose(out, out_ref, atol=2e-2, rtol=2e-2)

    print("KERNEL_OK")
</pallas_src>

<mosaic_0001>
module attributes {stable_mosaic.version = 11 : i64} {
  func.func @_layernorm_kernel(%arg0: i32, %arg1: memref<128x128xf32, #tpu.memory_space<vmem>>, %arg2: memref<1x128xf32, #tpu.memory_space<vmem>>, %arg3: memref<128x128xf32, #tpu.memory_space<vmem>>) attributes {dimension_semantics = [#tpu.dimension_semantics<parallel>], iteration_bounds = array<i64: 2>, scalar_prefetch = 0 : i64, scratch_operands = 0 : i64, tpu.core_type = #tpu.core_type<tc>, window_params = [{transform_indices = @transform_0, window_bounds = array<i64: 128, 128>}, {pipeline_mode = #tpu.pipeline_mode<synchronous>, transform_indices = @transform_1, window_bounds = array<i64: 1, 128>}, {transform_indices = @transform_2, window_bounds = array<i64: 128, 128>}]} {
    %c0 = arith.constant 0 : index
    %c0_0 = arith.constant 0 : index
    %0 = vector.load %arg1[%c0, %c0_0] : memref<128x128xf32, #tpu.memory_space<vmem>>, vector<128x128xf32>
    %cst = arith.constant dense<0.000000e+00> : vector<128xf32>
    %1 = vector.multi_reduction <add>, %0, %cst [1] : vector<128x128xf32> to vector<128xf32>
    %2 = vector.shape_cast %1 : vector<128xf32> to vector<128x1xf32>
    %cst_1 = arith.constant 1.280000e+02 : f32
    %3 = vector.broadcast %cst_1 : f32 to vector<128x1xf32>
    %4 = arith.divf %2, %3 : vector<128x1xf32>
    %5 = vector.broadcast %4 : vector<128x1xf32> to vector<128x128xf32>
    %6 = arith.subf %0, %5 : vector<128x128xf32>
    %7 = arith.mulf %6, %6 : vector<128x128xf32>
    %cst_2 = arith.constant dense<0.000000e+00> : vector<128xf32>
    %8 = vector.multi_reduction <add>, %7, %cst_2 [1] : vector<128x128xf32> to vector<128xf32>
    %9 = vector.shape_cast %8 : vector<128xf32> to vector<128x1xf32>
    %cst_3 = arith.constant 1.280000e+02 : f32
    %10 = vector.broadcast %cst_3 : f32 to vector<128x1xf32>
    %11 = arith.divf %9, %10 : vector<128x1xf32>
    %cst_4 = arith.constant 9.99999974E-6 : f32
    %12 = vector.broadcast %cst_4 : f32 to vector<128x1xf32>
    %13 = arith.addf %11, %12 : vector<128x1xf32>
    %14 = math.rsqrt %13 : vector<128x1xf32>
    %15 = vector.broadcast %14 : vector<128x1xf32> to vector<128x128xf32>
    %16 = arith.mulf %6, %15 : vector<128x128xf32>
    %c0_5 = arith.constant 0 : index
    %c0_6 = arith.constant 0 : index
    %17 = vector.load %arg2[%c0_5, %c0_6] : memref<1x128xf32, #tpu.memory_space<vmem>>, vector<1x128xf32>
    %18 = vector.broadcast %17 : vector<1x128xf32> to vector<128x128xf32>
    %19 = arith.mulf %16, %18 : vector<128x128xf32>
    %c0_7 = arith.constant 0 : index
    %c0_8 = arith.constant 0 : index
    %20 = vector.load %arg3[%c0_7, %c0_8] : memref<128x128xf32, #tpu.memory_space<vmem>>, vector<128x128xf32>
    tpu.vector_store %arg3[%c0_7, %c0_8], %19 {strides = array<i32>} : memref<128x128xf32, #tpu.memory_space<vmem>>, vector<128x128xf32>,
    return
  }
  func.func @transform_0(%arg0: i32) -> (i32, i32) {
    %c0_i32 = arith.constant 0 : i32
    %c0_i32_0 = arith.constant 0 : i32
    return %arg0, %c0_i32 : i32, i32
  }
  func.func @transform_1(%arg0: i32) -> (i32, i32) {
    %c0_i32 = arith.constant 0 : i32
    %c0_i32_0 = arith.constant 0 : i32
    %c0_i32_1 = arith.constant 0 : i32
    return %c0_i32, %c0_i32_0 : i32, i32
  }
  func.func @transform_2(%arg0: i32) -> (i32, i32) {
    %c0_i32 = arith.constant 0 : i32
    %c0_i32_0 = arith.constant 0 : i32
    return %arg0, %c0_i32 : i32, i32
  }
}

</mosaic_0001>

<bundles_post_ra>
// kernel: tpu_custom_call.1
= control target key start
LH: loop header
LB: loop body
LE: loop exit
PB: predicated region body
PF: predicated region fallthrough
CT: control target
= control target key end

     0   :  { %7 = vsyncpa [#allocation3], 0  ;;  %s1025_s0 = inlined_call_operand.hbm [shape: f32[256,128], index: 0, kind: input, shape index: {}]   ;;  %s1026_s1 = inlined_call_operand.vmem [shape: f32[1,128], index: 1, kind: input, shape index: {}]   ;;  %s1027_s2 = inlined_call_operand.hbm [shape: f32[256,128], index: 2, kind: output, shape index: {}]  }
   0x1   :  { %9 = vsyncpa [#allocation3 + $0x1], 0 }
   0x2   :  { %10 = vsyncpa [#allocation4], 0 }
   0x3   :  { %12 = vsyncpa [#allocation4 + $0x1], 0  ;;  %s701_s9 = smov 0   ;;  %s703_s10 = smov 0  }
   0x4   :  { %s705_s11 = smov 0   ;;  %s707_s12 = smov 0  }
   0x5 LB: > { %s722_s13 = sadd.s32 4294967295, %s678_s12   ;;  %s483_s14 = sadd.s32 4294967294, %s678_s12   ;;  %s678_s12 = sphi %s707_s12, %s1040_s12   ;;  %s674_s11 = sphi %s705_s11, %s1039_s11   ;;  %s670_s10 = sphi %s703_s10, %s1038_s10   ;;  %s666_s9 = sphi %s701_s9, %s1037_s9  }
   0x6   : > { %s726_s15 = sadd.s32 1, %s678_s12   ;;  %s25_s16 = sadd.s32 1, %s674_s11 }
   0x7   : > { %s22_s17 = ssub.s32 %s678_s12, %s726_s15  ;;  %p32_p0 = scmp.ne.s32.totalorder %s674_s11, %s670_s10 }
   0x8   : > { %p23_p1 = scmp.eq.s32.totalorder %s22_s17, 0  ;;  %p33_p2 = scmp.eq.s32.totalorder %s678_s12, 0 }
   0x9   : > { %p38_p3 = scmp.ne.s32.totalorder %s670_s10, %s666_s9  ;;  %p39_p4 = scmp.eq.s32.totalorder %s722_s13, 0 }
   0xa   : > { %s738_s18 = scalar_select %p23_p1, %s674_s11, %s25_s16  }
   0xb   : > { %p740_p5 = por %p33_p2, %p32_p0  ;;  %p744_p6 = por %p39_p4, %p38_p3 }
   0xc   : > { %p83_p7 = scmp.eq.s32.totalorder %s722_s13, 1  ;;  %p89_p8 = scmp.eq.s32.totalorder %s483_s14, 1 }
   0xd   : > { %p512_p10 = scmp.lt.s32.totalorder %s678_s12, 2  ;;  %s112_s23 = sand.u32 1, %s674_s11  }
   0xe   : > { %p751_p11 = por %p83_p7, %p32_p0  ;;  %p755_p12 = por %p89_p8, %p38_p3 }
   0xf   : > { %s498_s24 = sshll.u32 %s678_s12, 11  ;;  %s486_s25 = sshll.u32 %s112_s23, 7 }
  0x10   : > { %s1031_s21 = scalar_select %p751_p11, 1, 0 }
  0x11   : > { %s1032_s22 = scalar_select %p755_p12, 1, 0 }
  0x12   : > { %s764_s28 = scalar_lea.hbm %s1025_s0, %s498_s24  ;;  %s116_s29 = scalar_lea.vmem [#allocation2], %s486_s25 }
  0x13   : > { %s123_s30 = sshll.u32 %s116_s29, 4  ;;  %p768_p13 = pnand %p512_p10, %p740_p5  ;;  %s772_s30 = int_to_ptr.vmem [resolvable:$true] %s123_s30 }
  0x14   : > { %s774_s4 = scalar_lea.sflag [#allocation3], %s112_s23  ;;  %s582_s5 = scalar_lea.hbm %s764_s28, 2048 }
  0x15   : > { %p583_p0 = scmp.ne.s32.totalorder %s764_s28, %s582_s5  ;;  %p584_p1 = pneg %p768_p13 }
  0x16   : > { %s587_s8 = scalar_lea.hbm %s1025_s0, 4096  ;;  %p588_p4 = scmp.lt.u32.totalorder %s764_s28, %s1025_s0 }
  0x17   : > { %p585_p2 = pnand %p584_p1, %p583_p0  ;;  %p589_p5 = scmp.lt.u32.totalorder %s587_s8, %s582_s5 }
  0x18   : > { %p591_p8 = scmp.lt.u32.totalorder %s582_s5, %s764_s28 }
  0x19   : > { %p586_p3 = pneg %p585_p2  ;;  %p590_p7 = por %p589_p5, %p588_p4 }
  0x1b   : > { %p592_p10 = por %p591_p8, %p590_p7 }
  0x1d   : > { %p593_p9 = pnand %p592_p10, %p586_p3 }
  0x1f   : > { %596 = shalt.err (!%p593_p9)
}
  0x20   : > { %s597_s17 = scalar_lea.vmem %s772_s30, 2048  ;;  %s680_s19 = smov [#allocation2]  }
  0x21   : > { %p598_p0 = scmp.ne.s32.totalorder %s772_s30, %s597_s17  ;;  %s602_s23 = sshll.u32 %s680_s19, 4  ;;  %s603_s23 = int_to_ptr.vmem [resolvable:$false] %s602_s23 }
  0x22   : > { %s604_s24 = scalar_lea.vmem %s603_s23, 4096  ;;  %p605_p11 = scmp.lt.s32.totalorder %s772_s30, %s603_s23 }
  0x23   : > { %p600_p2 = pnand %p598_p0, %p584_p1  ;;  %p606_p4 = scmp.lt.s32.totalorder %s604_s24, %s597_s17 }
  0x25   : > { %p601_p12 = pneg %p600_p2  ;;  %p607_p5 = por %p606_p4, %p605_p11 }
  0x27   : > { %p608_p7 = pnand %p607_p5, %p601_p12 }
  0x29   : > { %611 = shalt.err (!%p608_p7)
}
  0x2a   : > { %s681_s25 = smov 128   ;;  %s682_s26 = smov 8  }
  0x2b   : > { %507 = dma.hbm_to_vmem [thread:$0]  (!%p768_p13), %s764_s28, 2048, %s772_s30, %s774_s4, %s681_s25, %s681_s25, %s682_s26  }
  0x2c   : > { %p489_p9 = scmp.ge.s32.totalorder %s678_s12, 1  ;;  %p131_p1 = scmp.lt.s32.totalorder %s678_s12, 3 }
  0x2e   : > { %p132_p3 = pnand %p489_p9, %p131_p1 }
  0x2f   : > { %s805_s27 = sand.u32 (!%p132_p3), 1, %s670_s10  }
  0x30   : > { %135 = sbr.rel (%p132_p3) target bundleno = 413 (0x19d), region = 28  ;;  %s490_s29 = sshll.u32 (!%p132_p3), %s805_s27, 7 }
  0x31   : > { %s138_s5 = scalar_lea.sflag (!%p132_p3), [#allocation3], %s805_s27  ;;  %s811_s6 = scalar_lea.vmem (!%p132_p3), [#allocation2], %s490_s29 }
  0x37   : > { %657 = dma.done.wait (%p744_p6), %s138_s5, 2048  }
  0x38   : > { %659 = vsyncadd (%p744_p6), %s138_s5, 4294965248  ;;  %v164_v0 = vld [vmem:[%s811_s6] sm:$0xff]  ;;  %v166_v1 = vld [vmem:[%s811_s6 + $0x10] sm:$0xff]  ;;  %s926_s30 = scalar_lea.vmem [#allocation5], %s490_s29  ;;  %s499_s3 = sshll.u32 %s722_s13, 11 }
  0x39   : > { %180 = vadd.xlane.f32.xlu0 %v164_v0  ;;  %184 = vadd.xlane.f32.xlu1 %v166_v1  ;;  %v165_v2 = vld [vmem:[%s811_s6 + $0x8] sm:$0xff]  ;;  %v167_v3 = vld [vmem:[%s811_s6 + $0x18] sm:$0xff]  ;;  %v168_v4 = vld [vmem:[%s811_s6 + $0x20] sm:$0xff]  ;;  %s410_s4 = sshll.u32 %s926_s30, 4  ;;  %s977_s14 = scalar_lea.hbm %s1027_s2, %s499_s3  ;;  %s979_s4 = int_to_ptr.vmem [resolvable:$true] %s410_s4 }
  0x3a   : > { %v169_v5 = vld [vmem:[%s811_s6 + $0x28] sm:$0xff]  ;;  %v170_v6 = vld [vmem:[%s811_s6 + $0x30] sm:$0xff]  ;;  %v171_v7 = vld [vmem:[%s811_s6 + $0x38] sm:$0xff]  ;;  %s397_s13 = scalar_lea.sflag [#allocation4], %s805_s27  ;;  %s612_s16 = scalar_lea.vmem %s979_s4, 2048 }
  0x3b   : > { %v172_v8 = vld [vmem:[%s811_s6 + $0x40] sm:$0xff]  ;;  %v173_v9 = vld [vmem:[%s811_s6 + $0x48] sm:$0xff]  ;;  %v174_v10 = vld [vmem:[%s811_s6 + $0x50] sm:$0xff]  ;;  %p613_p6 = scmp.ne.s32.totalorder %s979_s4, %s612_s16  ;;  %p1034_p11 = scmp.ne.s32.totalorder %s1031_s21, 0 }
  0x3c   : > { %v829_v11 = vld [vmem:[%s811_s6 + $0x58] sm:$0xff]  ;;  %v833_v12 = vld [vmem:[%s811_s6 + $0x60] sm:$0xff]  ;;  %v836_v13 = vld [vmem:[%s811_s6 + $0x68] sm:$0xff]  ;;  %s683_s17 = smov [#allocation5]  }
  0x3d   : > { %182 = vadd.xlane.f32.xlu0 %v165_v2  ;;  %186 = vadd.xlane.f32.xlu1 %v167_v3  ;;  %v841_v14 = vld [vmem:[%s811_s6 + $0x70] sm:$0xff]  ;;  %v844_v15 = vld [vmem:[%s811_s6 + $0x78] sm:$0xff]  ;;  %p614_p12 = pnand %p613_p6, %p1034_p11  ;;  %s616_s19 = sshll.u32 %s683_s17, 4  ;;  %s617_s19 = int_to_ptr.vmem [resolvable:$false] %s616_s19 }
  0x3e   : > { %s618_s23 = scalar_lea.vmem %s617_s19, 4096  ;;  %p619_p8 = scmp.lt.s32.totalorder %s979_s4, %s617_s19 }
  0x3f   : > { %p615_p13 = pneg %p614_p12  ;;  %p620_p10 = scmp.lt.s32.totalorder %s618_s23, %s612_s16 }
  0x41   : > { %188 = vadd.xlane.f32.xlu0 %v168_v4  ;;  %190 = vadd.xlane.f32.xlu1 %v169_v5  ;;  %p621_p0 = por %p620_p10, %p619_p8 }
  0x43   : > { %p622_p2 = pnand %p621_p0, %p615_p13 }
  0x45   : > { %192 = vadd.xlane.f32.xlu0 %v170_v6  ;;  %194 = vadd.xlane.f32.xlu1 %v171_v7 }
  0x49   : > { %196 = vadd.xlane.f32.xlu0 %v172_v8  ;;  %198 = vadd.xlane.f32.xlu1 %v173_v9 }
  0x4d   : > { %200 = vadd.xlane.f32.xlu0 %v174_v10  ;;  %202 = vadd.xlane.f32.xlu1 %v829_v11 }
  0x51   : > { %204 = vadd.xlane.f32.xlu0 %v833_v12  ;;  %206 = vadd.xlane.f32.xlu1 %v836_v13 }
  0x55   : > { %208 = vadd.xlane.f32.xlu0 %v841_v14  ;;  %210 = vadd.xlane.f32.xlu1 %v844_v15 }
  0xc6   : > { %v181_v16 = vpop.xlane.xlu0 %180  ;;  %v185_v17 = vpop.xlane.xlu1 %184 }
  0xc7   : > { %v213_v18 = vmul.f32 0.0078125, %v181_v16  ;;  %v215_v19 = vmul.f32 0.0078125, %v185_v17 }
  0xc9   : > { %v848_v20 = vsub.f32 %v164_v0, %v213_v18  ;;  %v850_v21 = vsub.f32 %v166_v1, %v215_v19 }
  0xca   : > { %v183_v22 = vpop.xlane.xlu0 %182  ;;  %v187_v23 = vpop.xlane.xlu1 %186 }
  0xcb   : > { %v214_v24 = vmul.f32 0.0078125, %v183_v22  ;;  %v245_v25 = vmul.f32 %v848_v20, %v848_v20  ;;  %v216_v26 = vmul.f32 0.0078125, %v187_v23  ;;  %v247_v29 = vmul.f32 %v850_v21, %v850_v21 }
  0xcd   : > { %v854_v27 = vsub.f32 %v165_v2, %v214_v24  ;;  %261 = vadd.xlane.f32.xlu0 %v245_v25  ;;  %v856_v28 = vsub.f32 %v167_v3, %v216_v26 }
  0xce   : > { %v189_v30 = vpop.xlane.xlu0 %188  ;;  %v191_v31 = vpop.xlane.xlu1 %190 }
  0xcf   : > { %v217_v32 = vmul.f32 0.0078125, %v189_v30  ;;  %v246_v33 = vmul.f32 %v854_v27, %v854_v27  ;;  %v218_v34 = vmul.f32 0.0078125, %v191_v31  ;;  %v248_v37 = vmul.f32 %v856_v28, %v856_v28 }
  0xd1   : > { %v862_v35 = vsub.f32 %v168_v4, %v217_v32  ;;  %265 = vadd.xlane.f32.xlu0 %v247_v29  ;;  %263 = vadd.xlane.f32.xlu1 %v246_v33  ;;  %v864_v36 = vsub.f32 %v169_v5, %v218_v34 }
  0xd2   : > { %v193_v38 = vpop.xlane.xlu0 %192  ;;  %v195_v39 = vpop.xlane.xlu1 %194 }
  0xd3   : > { %v219_v40 = vmul.f32 0.0078125, %v193_v38  ;;  %v249_v41 = vmul.f32 %v862_v35, %v862_v35  ;;  %v220_v42 = vmul.f32 0.0078125, %v195_v39  ;;  %v250_v45 = vmul.f32 %v864_v36, %v864_v36 }
  0xd5   : > { %v870_v43 = vsub.f32 %v170_v6, %v219_v40  ;;  %267 = vadd.xlane.f32.xlu1 %v248_v37  ;;  %269 = vadd.xlane.f32.xlu0 %v249_v41  ;;  %v872_v44 = vsub.f32 %v171_v7, %v220_v42  ;;  %v920_v42 = vld [vmem:[%s1026_s1] ss:$0 sm:$0xff] }
  0xd6   : > { %v197_v46 = vpop.xlane.xlu0 %196  ;;  %v199_v47 = vpop.xlane.xlu1 %198 }
  0xd7   : > { %v221_v48 = vmul.f32 0.0078125, %v197_v46  ;;  %v251_v49 = vmul.f32 %v870_v43, %v870_v43  ;;  %v222_v50 = vmul.f32 0.0078125, %v199_v47  ;;  %v252_v53 = vmul.f32 %v872_v44, %v872_v44 }
  0xd9   : > { %v878_v51 = vsub.f32 %v172_v8, %v221_v48  ;;  %271 = vadd.xlane.f32.xlu1 %v250_v45  ;;  %273 = vadd.xlane.f32.xlu0 %v251_v49  ;;  %v880_v52 = vsub.f32 %v173_v9, %v222_v50 }
  0xda   : > { %v201_v54 = vpop.xlane.xlu0 %200  ;;  %v203_v55 = vpop.xlane.xlu1 %202 }
  0xdb   : > { %v223_v56 = vmul.f32 0.0078125, %v201_v54  ;;  %v253_v57 = vmul.f32 %v878_v51, %v878_v51  ;;  %v224_v58 = vmul.f32 0.0078125, %v203_v55  ;;  %v254_v61 = vmul.f32 %v880_v52, %v880_v52 }
  0xdd   : > { %v886_v59 = vsub.f32 %v174_v10, %v223_v56  ;;  %275 = vadd.xlane.f32.xlu1 %v252_v53  ;;  %277 = vadd.xlane.f32.xlu0 %v253_v57  ;;  %v889_v60 = vsub.f32 %v829_v11, %v224_v58 }
  0xde   : > { %v205_v62 = vpop.xlane.xlu0 %204  ;;  %v207_v63 = vpop.xlane.xlu1 %206 }
  0xdf   : > { %v225_v0 = vmul.f32 0.0078125, %v205_v62  ;;  %v255_v1 = vmul.f32 %v886_v59, %v886_v59  ;;  %v226_v2 = vmul.f32 0.0078125, %v207_v63  ;;  %v256_v5 = vmul.f32 %v889_v60, %v889_v60 }
  0xe1   : > { %v896_v3 = vsub.f32 %v833_v12, %v225_v0  ;;  %279 = vadd.xlane.f32.xlu1 %v254_v61  ;;  %281 = vadd.xlane.f32.xlu0 %v255_v1  ;;  %v899_v4 = vsub.f32 %v836_v13, %v226_v2 }
  0xe2   : > { %v209_v6 = vpop.xlane.xlu0 %208  ;;  %v211_v7 = vpop.xlane.xlu1 %210 }
  0xe3   : > { %v227_v8 = vmul.f32 0.0078125, %v209_v6  ;;  %v257_v9 = vmul.f32 %v896_v3, %v896_v3  ;;  %v228_v10 = vmul.f32 0.0078125, %v211_v7  ;;  %v258_v13 = vmul.f32 %v899_v4, %v899_v4 }
  0xe5   : > { %v906_v11 = vsub.f32 %v841_v14, %v227_v8  ;;  %283 = vadd.xlane.f32.xlu1 %v256_v5  ;;  %285 = vadd.xlane.f32.xlu0 %v257_v9  ;;  %v909_v12 = vsub.f32 %v844_v15, %v228_v10 }
  0xe7   : > { %v259_v16 = vmul.f32 %v906_v11, %v906_v11  ;;  %v260_v17 = vmul.f32 %v909_v12, %v909_v12 }
  0xe9   : > { %287 = vadd.xlane.f32.xlu1 %v258_v13  ;;  %289 = vadd.xlane.f32.xlu0 %v259_v16 }
  0xed   : > { %291 = vadd.xlane.f32.xlu1 %v260_v17 }
 0x15a   : > { %v262_v18 = vpop.xlane.xlu0 %261 }
 0x15b   : > { %v293_v14 = vmul.f32 0.0078125, %v262_v18 }
 0x15d   : > { %v309_v19 = vadd.f32 1e-05, %v293_v14 }
 0x15e   : > { %v264_v22 = vpop.xlane.xlu1 %263  ;;  %v266_v23 = vpop.xlane.xlu0 %265 }
 0x15f   : > { %550 = vrsqrt.f32 %v309_v19  ;;  %v294_v15 = vmul.f32 0.0078125, %v264_v22  ;;  %v295_v24 = vmul.f32 0.0078125, %v266_v23 }
 0x161   : > { %v310_v25 = vadd.f32 1e-05, %v294_v15  ;;  %v311_v26 = vadd.f32 1e-05, %v295_v24 }
 0x162   : > { %v268_v29 = vpop.xlane.xlu1 %267  ;;  %v270_v30 = vpop.xlane.xlu0 %269 }
 0x163   : > { %552 = vrsqrt.f32 %v310_v25  ;;  %v296_v31 = vmul.f32 0.0078125, %v268_v29  ;;  %v297_v32 = vmul.f32 0.0078125, %v270_v30 }
 0x164   : > { %554 = vrsqrt.f32 %v311_v26 }
 0x165   : > { %v312_v33 = vadd.f32 1e-05, %v296_v31  ;;  %v313_v34 = vadd.f32 1e-05, %v297_v32 }
 0x166   : > { %v272_v37 = vpop.xlane.xlu1 %271  ;;  %v274_v38 = vpop.xlane.xlu0 %273 }
 0x167   : > { %556 = vrsqrt.f32 %v312_v33  ;;  %v298_v39 = vmul.f32 0.0078125, %v272_v37  ;;  %v299_v40 = vmul.f32 0.0078125, %v274_v38 }
 0x168   : > { %558 = vrsqrt.f32 %v313_v34 }
 0x169   : > { %v551_v41 = vpop.eup %550  ;;  %v314_v45 = vadd.f32 1e-05, %v298_v39  ;;  %v315_v46 = vadd.f32 1e-05, %v299_v40 }
 0x16a   : > { %v341_v47 = vmul.f32 %v551_v41, %v848_v20  ;;  %v276_v48 = vpop.xlane.xlu1 %275  ;;  %v278_v49 = vpop.xlane.xlu0 %277 }
 0x16b   : > { %560 = vrsqrt.f32 %v314_v45  ;;  %v300_v50 = vmul.f32 0.0078125, %v276_v48  ;;  %v301_v53 = vmul.f32 0.0078125, %v278_v49 }
 0x16c   : > { %v364_v54 = vmul.f32 %v920_v42, %v341_v47  ;;  %562 = vrsqrt.f32 %v315_v46 }
 0x16d   : > { %v553_v55 = vpop.eup %552  ;;  %v316_v56 = vadd.f32 1e-05, %v300_v50  ;;  %v317_v57 = vadd.f32 1e-05, %v301_v53 }
 0x16e   : > { %v555_v58 = vpop.eup %554  ;;  %380 = vst [vmem:[%s926_s30] sm:$0xff] %v364_v54  ;;  %v342_v20 = vmul.f32 %v553_v55, %v854_v27  ;;  %v280_v61 = vpop.xlane.xlu1 %279 }
 0x16f   : > { %v282_v62 = vpop.xlane.xlu0 %281  ;;  %v343_v63 = vmul.f32 %v555_v58, %v850_v21  ;;  %564 = vrsqrt.f32 %v316_v56  ;;  %v302_v0 = vmul.f32 0.0078125, %v280_v61 }
 0x170   : > { %v303_v1 = vmul.f32 0.0078125, %v282_v62  ;;  %v365_v2 = vmul.f32 %v920_v42, %v342_v20  ;;  %566 = vrsqrt.f32 %v317_v57 }
 0x171   : > { %v557_v5 = vpop.eup %556  ;;  %v366_v6 = vmul.f32 %v920_v42, %v343_v63  ;;  %v318_v7 = vadd.f32 1e-05, %v302_v0 }
 0x172   : > { %v319_v8 = vadd.f32 1e-05, %v303_v1  ;;  %v559_v9 = vpop.eup %558  ;;  %381 = vst [vmem:[%s926_s30 + $0x8] sm:$0xff] %v365_v2  ;;  %v344_v27 = vmul.f32 %v557_v5, %v856_v28  ;;  %v284_v10 = vpop.xlane.xlu1 %283 }
 0x173   : > { %v286_v13 = vpop.xlane.xlu0 %285  ;;  %382 = vst [vmem:[%s926_s30 + $0x10] sm:$0xff] %v366_v6  ;;  %v345_v21 = vmul.f32 %v559_v9, %v862_v35  ;;  %568 = vrsqrt.f32 %v318_v7  ;;  %v304_v16 = vmul.f32 0.0078125, %v284_v10 }
 0x174   : > { %v305_v17 = vmul.f32 0.0078125, %v286_v13  ;;  %v367_v18 = vmul.f32 %v920_v42, %v344_v27  ;;  %570 = vrsqrt.f32 %v319_v8 }
 0x175   : > { %v561_v14 = vpop.eup %560  ;;  %v368_v19 = vmul.f32 %v920_v42, %v345_v21  ;;  %v320_v22 = vadd.f32 1e-05, %v304_v16 }
 0x176   : > { %v321_v23 = vadd.f32 1e-05, %v305_v17  ;;  %v563_v15 = vpop.eup %562  ;;  %383 = vst [vmem:[%s926_s30 + $0x18] sm:$0xff] %v367_v18  ;;  %v346_v28 = vmul.f32 %v561_v14, %v864_v36  ;;  %v288_v24 = vpop.xlane.xlu1 %287 }
 0x177   : > { %v290_v25 = vpop.xlane.xlu0 %289  ;;  %384 = vst [vmem:[%s926_s30 + $0x20] sm:$0xff] %v368_v19  ;;  %v347_v35 = vmul.f32 %v563_v15, %v870_v43  ;;  %572 = vrsqrt.f32 %v320_v22  ;;  %v306_v26 = vmul.f32 0.0078125, %v288_v24 }
 0x178   : > { %v307_v29 = vmul.f32 0.0078125, %v290_v25  ;;  %v369_v30 = vmul.f32 %v920_v42, %v346_v28  ;;  %574 = vrsqrt.f32 %v321_v23 }
 0x179   : > { %v565_v31 = vpop.eup %564  ;;  %v370_v32 = vmul.f32 %v920_v42, %v347_v35  ;;  %v322_v33 = vadd.f32 1e-05, %v306_v26 }
 0x17a   : > { %v323_v34 = vadd.f32 1e-05, %v307_v29  ;;  %v567_v37 = vpop.eup %566  ;;  %385 = vst [vmem:[%s926_s30 + $0x28] sm:$0xff] %v369_v30  ;;  %v348_v36 = vmul.f32 %v565_v31, %v872_v44  ;;  %v292_v38 = vpop.xlane.xlu1 %291 }
 0x17b   : > { %386 = vst [vmem:[%s926_s30 + $0x30] sm:$0xff] %v370_v32  ;;  %v349_v43 = vmul.f32 %v567_v37, %v878_v51  ;;  %576 = vrsqrt.f32 %v322_v33  ;;  %v308_v39 = vmul.f32 0.0078125, %v292_v38 }
 0x17c   : > { %v371_v40 = vmul.f32 %v920_v42, %v348_v36  ;;  %578 = vrsqrt.f32 %v323_v34 }
 0x17d   : > { %v569_v41 = vpop.eup %568  ;;  %v372_v45 = vmul.f32 %v920_v42, %v349_v43  ;;  %v324_v46 = vadd.f32 1e-05, %v308_v39 }
 0x17e   : > { %v571_v47 = vpop.eup %570  ;;  %387 = vst [vmem:[%s926_s30 + $0x38] sm:$0xff] %v371_v40  ;;  %v350_v48 = vmul.f32 %v569_v41, %v880_v52 }
 0x17f   : > { %388 = vst [vmem:[%s926_s30 + $0x40] sm:$0xff] %v372_v45  ;;  %v351_v44 = vmul.f32 %v571_v47, %v886_v59  ;;  %580 = vrsqrt.f32 %v324_v46 }
 0x180   : > { %v373_v51 = vmul.f32 %v920_v42, %v350_v48 }
 0x181   : > { %v573_v49 = vpop.eup %572  ;;  %v374_v50 = vmul.f32 %v920_v42, %v351_v44 }
 0x182   : > { %v575_v53 = vpop.eup %574  ;;  %389 = vst [vmem:[%s926_s30 + $0x48] sm:$0xff] %v373_v51  ;;  %v352_v54 = vmul.f32 %v573_v49, %v889_v60 }
 0x183   : > { %390 = vst [vmem:[%s926_s30 + $0x50] sm:$0xff] %v374_v50  ;;  %v353_v52 = vmul.f32 %v575_v53, %v896_v3 }
 0x184   : > { %v375_v59 = vmul.f32 %v920_v42, %v352_v54 }
 0x185   : > { %v577_v55 = vpop.eup %576  ;;  %v376_v56 = vmul.f32 %v920_v42, %v353_v52 }
 0x186   : > { %v579_v57 = vpop.eup %578  ;;  %391 = vst [vmem:[%s926_s30 + $0x58] sm:$0xff] %v375_v59  ;;  %v354_v58 = vmul.f32 %v577_v55, %v899_v4 }
 0x187   : > { %392 = vst [vmem:[%s926_s30 + $0x60] sm:$0xff] %v376_v56  ;;  %v355_v20 = vmul.f32 %v579_v57, %v906_v11 }
 0x188   : > { %v377_v60 = vmul.f32 %v920_v42, %v354_v58 }
 0x189   : > { %v581_v3 = vpop.eup %580  ;;  %v378_v61 = vmul.f32 %v920_v42, %v355_v20 }
 0x18a   : > { %393 = vst [vmem:[%s926_s30 + $0x68] sm:$0xff] %v377_v60  ;;  %v356_v62 = vmul.f32 %v581_v3, %v909_v12 }
 0x18b   : > { %394 = vst [vmem:[%s926_s30 + $0x70] sm:$0xff] %v378_v61 }
 0x18c   : > { %v379_v4 = vmul.f32 %v920_v42, %v356_v62 }
 0x18e   : > { %395 = vst [vmem:[%s926_s30 + $0x78] sm:$0xff] %v379_v4 }
 0x18f   : > { %625 = shalt.err (!%p622_p2)
}
 0x190   : > { %s626_s24 = scalar_lea.hbm %s977_s14, 2048  ;;  %s630_s29 = scalar_lea.hbm %s1027_s2, 4096 }
 0x191   : > { %p627_p4 = scmp.ne.s32.totalorder %s977_s14, %s626_s24  ;;  %p631_p9 = scmp.lt.u32.totalorder %s977_s14, %s1027_s2 }
 0x192   : > { %p632_p1 = scmp.lt.u32.totalorder %s630_s29, %s626_s24  ;;  %p634_p6 = scmp.lt.u32.totalorder %s626_s24, %s977_s14 }
 0x193   : > { %p628_p5 = pnand %p627_p4, %p1034_p11 }
 0x194   : > { %p633_p3 = por %p632_p1, %p631_p9 }
 0x195   : > { %p629_p7 = pneg %p628_p5 }
 0x196   : > { %p635_p12 = por %p634_p6, %p633_p3 }
 0x198   : > { %p636_p13 = pnand %p635_p12, %p629_p7 }
 0x19a   : > { %639 = shalt.err (!%p636_p13)
}
 0x19b   : > { %s684_s20 = smov 128   ;;  %s685_s28 = smov 8  }
 0x19c   : > { %502 = dma.vmem_to_hbm [thread:$0]  (%p1034_p11), %s979_s4, 2048, %s977_s14, %s397_s13, %s684_s20, %s684_s20, %s685_s28  }
 0x19d PF: > { %s425_s30 = sand.u32 1, %s666_s9   ;;  %p1035_p8 = scmp.ne.s32.totalorder %s1032_s22, 0 }
 0x19e   : > { %p1036_p10 = scmp.ge.s32.totalorder %s678_s12, 2  ;;  %s426_s3 = scalar_lea.sflag [#allocation4], %s425_s30 }
 0x1a0   : > { %p509_p0 = pnand %p1036_p10, %p1035_p8 }
 0x1a2   : > { %661 = dma.done.wait (!%p509_p0), %s426_s3, 2048  }
 0x1a3   : > { %663 = vsyncadd (!%p509_p0), %s426_s3, 4294965248  ;;  %p15_p2 = scmp.ge.s32.totalorder %s726_s15, 4   ;;  %s1037_s9 = smov %s670_s10 }
 0x1a4   : > { %s1038_s10 = smov %s674_s11  ;;  %s1039_s11 = smov %s738_s18 }
 0x1a5   : > { %s1040_s12 = smov %s726_s15  ;;  %17 = sbr.rel (!%p15_p2) target bundleno = 5 (0x5), region = 73 }
 0x1ac   :  { %431 = vsyncpa [#allocation3], 1 }
 0x1ad   :  { %433 = vsyncpa [#allocation3 + $0x1], 1 }
 0x1ae   :  { %434 = vsyncpa [#allocation4], 1 }
 0x1af   :  { %436 = vsyncpa [#allocation4 + $0x1], 1 }

</bundles_post_ra>
